<compile_context>
chip_gen: v7x
topology: tpu7x:2x2x1
jax: 0.10.0
libtpu: 0.0.40
codegen_flags: <defaults>
</compile_context>

<pallas_src>
import jax
import jax.numpy as jnp
from jax.experimental import pallas as pl
from jax.experimental.pallas import tpu as pltpu


# --------------------------- fused Pallas kernel ----------------------------

def make_fused_kernel(arch, new_arch, mlp_positions):
    """Build a single kernel that runs the whole ModelOp_Tattetion forward.

    Ref order: s0, adj_nor, adj_com, adj_sing, pre_wT, pre_b, cls_wT, cls_b,
               gate, (mlp_wT_k, mlp_b_k) for each MLP position, out.
    """
    arch = tuple(arch)
    new_arch = tuple(new_arch)
    mlp_positions = tuple(mlp_positions)
    n_mlp = len(mlp_positions)

    def kernel(*refs):
        (s0_ref, adj_nor_ref, adj_com_ref, adj_sing_ref,
         pre_wT_ref, pre_b_ref, cls_wT_ref, cls_b_ref, gate_ref) = refs[:9]
        mlp_refs = refs[9:9 + 2 * n_mlp]
        o_ref = refs[9 + 2 * n_mlp]

        adj_refs = {2: adj_nor_ref, 3: adj_com_ref, 4: adj_sing_ref}
        mlp_wT = {}
        mlp_b = {}
        for k, pos in enumerate(mlp_positions):
            mlp_wT[pos] = mlp_refs[2 * k]
            mlp_b[pos] = mlp_refs[2 * k + 1]

        def linear(x, wT_ref, b_ref, relu):
            # x @ W.T + b  (weights pre-transposed once outside the kernel)
            y = jnp.dot(x, wT_ref[...], preferred_element_type=jnp.float32)
            y = y + b_ref[...]
            return jnp.maximum(y, 0.0) if relu else y

        def apply_op(i, x):
            code = new_arch[i]
            if code == 0:   # MLP(hid, hid), last=False -> ReLU (dropout = identity, eval)
                return linear(x, mlp_wT[i], mlp_b[i], True)
            return jnp.dot(adj_refs[code][...], x,
                           preferred_element_type=jnp.float32)

        # sigmoid of the whole gate vector once (EUP vector op), then extract
        # scalars at static indices for the weighted sums.
        gs = jax.nn.sigmoid(gate_ref[...])          # (1, num_T)

        def gated_sum_T(tempT, count):
            acc = gs[0, 0] * tempT[0]
            for j in range(1, count):
                acc = acc + gs[0, j] * tempT[j]
            return acc

        s0 = s0_ref[...]

        # ----- mirror of ModelOp_Tattetion.forward (static, trace-time) -----
        tempP, numP, point, totalP = [], [], 0, 0
        tempT, numT = [], []
        res = None
        for i in range(len(arch)):
            if i == 0:
                res = linear(s0, pre_wT_ref, pre_b_ref, False)    # preprocess0 (last=True)
                tempP.append(res); numP.append(i); totalP += 1
                res = apply_op(i, res)
                if arch[i] == 1:
                    tempP.append(res); numP.append(i); totalP += 1
                else:
                    tempT.append(res); numT.append(i)
                    numP, tempP = [], []
            elif arch[i - 1] == 1:
                if arch[i] == 0:
                    res = sum(tempP)
                    res = apply_op(i, res)
                    tempT.append(res); numT.append(i)
                    numP, tempP = [], []
                else:
                    res = apply_op(i, res)
                    tempP.append(res); numP.append(i - point); totalP += 1
            elif arch[i] == 1:
                res = apply_op(i, res)
                tempP.append(res); point = i; numP.append(i - point); totalP += 1
            else:
                res = gated_sum_T(tempT, len(numT))
                res = apply_op(i, res)
                numT.append(i); tempT.append(res)

        if len(numP) > 0 or len(tempP) > 0:
            res = sum(tempP)
        else:
            res = gated_sum_T(tempT, len(numT))

        res = linear(res, cls_wT_ref, cls_b_ref, False)           # classifier (last=True)

        # log_softmax along classes (max-stabilized)
        m = jnp.max(res, axis=1, keepdims=True)
        s = res - m
        lse = jnp.log(jnp.sum(jnp.exp(s), axis=1, keepdims=True))
        o_ref[...] = s - lse

    return kernel


def model_forward_pallas(s0, flat_inputs, *, arch, new_arch, mlp_positions,
                         num_classes):
    kernel = make_fused_kernel(arch, new_arch, mlp_positions)
    n_in = 1 + len(flat_inputs)
    # Whole-array VMEM specs, no grid: a single straight DMA per operand, one
    # kernel launch for the whole model.
    in_specs = [pl.BlockSpec(memory_space=pltpu.MemorySpace.VMEM)
                for _ in range(n_in)]
    out_spec = pl.BlockSpec(memory_space=pltpu.MemorySpace.VMEM)
    return pl.pallas_call(
        kernel,
        out_shape=jax.ShapeDtypeStruct((s0.shape[0], num_classes), jnp.float32),
        in_specs=in_specs,
        out_specs=out_spec,
    )(s0, *flat_inputs)


def build_kernel_inputs(params, mlp_positions):
    """One-time glue: pre-transpose weights, 2-D-ify biases & gate."""
    num_t = max(1, params["gateT"].shape[0])
    gate2 = jnp.zeros((1, num_t), jnp.float32).at[0, :params["gateT"].shape[0]].set(
        params["gateT"])
    flat = [
        params["adj_nor"], params["adj_com"], params["adj_sing"],
        jnp.transpose(params["pre_w"]), params["pre_b"].reshape(1, -1),
        jnp.transpose(params["cls_w"]), params["cls_b"].reshape(1, -1),
        gate2,
    ]
    for p in mlp_positions:
        flat.append(jnp.transpose(params["op_w"][p]))
        flat.append(params["op_b"][p].reshape(1, -1))
    return flat


# ----------------------- pure-jnp reference (validation) --------------------

def reference_forward(s0, params, arch, new_arch):
    def linear(x, w, b, relu):
        y = x @ w.T + b
        return jnp.maximum(y, 0.0) if relu else y

    adj = {2: params["adj_nor"], 3: params["adj_com"], 4: params["adj_sing"]}
    gate = params["gateT"]

    def apply_op(i, x):
        if new_arch[i] == 0:
            return linear(x, params["op_w"][i], params["op_b"][i], True)
        return adj[new_arch[i]] @ x

    tempP, numP, point, totalP = [], [], 0, 0
    tempT, numT = [], []
    res = None
    for i in range(len(arch)):
        if i == 0:
            res = linear(s0, params["pre_w"], params["pre_b"], False)
            tempP.append(res); numP.append(i); totalP += 1
            res = apply_op(i, res)
            if arch[i] == 1:
                tempP.append(res); numP.append(i); totalP += 1
            else:
                tempT.append(res); numT.append(i); numP, tempP = [], []
        elif arch[i - 1] == 1:
            if arch[i] == 0:
                res = sum(tempP)
                res = apply_op(i, res)
                tempT.append(res); numT.append(i); numP, tempP = [], []
            else:
                res = apply_op(i, res)
                tempP.append(res); numP.append(i - point); totalP += 1
        elif arch[i] == 1:
            res = apply_op(i, res)
            tempP.append(res); point = i; numP.append(i - point); totalP += 1
        else:
            res = sum(jax.nn.sigmoid(gate[j]) * tempT[j] for j in range(len(numT)))
            res = apply_op(i, res)
            numT.append(i); tempT.append(res)

    if len(numP) > 0 or len(tempP) > 0:
        res = sum(tempP)
    else:
        res = sum(jax.nn.sigmoid(gate[j]) * tempT[j] for j in range(len(numT)))
    res = linear(res, params["cls_w"], params["cls_b"], False)
    return jax.nn.log_softmax(res, axis=1)


# ----------------------------------- main -----------------------------------

if __name__ == "__main__":
    key = jax.random.PRNGKey(0)
    N_NODES, FEAT, HID, NCLS = 16, 32, 32, 8

    # arch: 1 = Graph op, 0 = MLP op. Exercises plain tempP sums, gated tempT
    # sums (1 and 3 terms) and all three adjacencies.
    arch = [1, 1, 0, 0, 1, 0]
    # deterministic stand-in for the random.randint() op choice in __init__:
    new_arch = [2, 3, 0, 0, 4, 0]        # adj_nor, adj_com, MLP, MLP, adj_sing, MLP
    mlp_positions = [i for i, a in enumerate(arch) if a == 0]
    num_T = len(mlp_positions)           # gateT size (= number of MLP ops)

    keys = jax.random.split(key, 12)

    def rand(k, shape, scale=0.1):
        return scale * jax.random.normal(k, shape, dtype=jnp.float32)

    def make_adj(k):
        a = jax.random.uniform(k, (N_NODES, N_NODES), dtype=jnp.float32)
        a = a + jnp.eye(N_NODES, dtype=jnp.float32)
        return a / jnp.sum(a, axis=1, keepdims=True)   # row-normalized adjacency

    params = {
        "adj_nor": make_adj(keys[0]),
        "adj_com": make_adj(keys[1]),
        "adj_sing": make_adj(keys[2]),
        "pre_w": rand(keys[3], (HID, FEAT)),     # PyTorch layout (out, in)
        "pre_b": rand(keys[4], (HID,)),
        "cls_w": rand(keys[5], (NCLS, HID)),
        "cls_b": rand(keys[6], (NCLS,)),
        "gateT": 1e-5 * jax.random.normal(keys[7], (num_T,), dtype=jnp.float32),
        "op_w": {},
        "op_b": {},
    }
    mlp_keys = jax.random.split(keys[8], 2 * len(arch))
    for i in mlp_positions:
        params["op_w"][i] = rand(mlp_keys[2 * i], (HID, HID))
        params["op_b"][i] = rand(mlp_keys[2 * i + 1], (HID,))

    s0 = rand(keys[9], (N_NODES, FEAT), scale=1.0)

    # One-time parameter plumbing (pre-transposed weights, 2-D biases/gate).
    flat_inputs = build_kernel_inputs(params, mlp_positions)

    out = model_forward_pallas(s0, flat_inputs, arch=arch, new_arch=new_arch,
                               mlp_positions=mlp_positions, num_classes=NCLS)
    out = jax.block_until_ready(out)

    ref = reference_forward(s0, params, arch, new_arch)
    assert out.shape == (N_NODES, NCLS)
    assert bool(jnp.allclose(out, ref, atol=1e-4, rtol=1e-4)), \
        "mismatch vs jnp reference"

    print("KERNEL_OK")
</pallas_src>

<mosaic_0001>
module attributes {stable_mosaic.version = 11 : i64} {
  func.func @kernel(%arg0: memref<16x32xf32, #tpu.memory_space<vmem>>, %arg1: memref<16x16xf32, #tpu.memory_space<vmem>>, %arg2: memref<16x16xf32, #tpu.memory_space<vmem>>, %arg3: memref<16x16xf32, #tpu.memory_space<vmem>>, %arg4: memref<32x32xf32, #tpu.memory_space<vmem>>, %arg5: memref<1x32xf32, #tpu.memory_space<vmem>>, %arg6: memref<32x8xf32, #tpu.memory_space<vmem>>, %arg7: memref<1x8xf32, #tpu.memory_space<vmem>>, %arg8: memref<1x3xf32, #tpu.memory_space<vmem>>, %arg9: memref<32x32xf32, #tpu.memory_space<vmem>>, %arg10: memref<1x32xf32, #tpu.memory_space<vmem>>, %arg11: memref<32x32xf32, #tpu.memory_space<vmem>>, %arg12: memref<1x32xf32, #tpu.memory_space<vmem>>, %arg13: memref<32x32xf32, #tpu.memory_space<vmem>>, %arg14: memref<1x32xf32, #tpu.memory_space<vmem>>, %arg15: memref<16x8xf32, #tpu.memory_space<vmem>>) attributes {dimension_semantics = [], scalar_prefetch = 0 : i64, scratch_operands = 0 : i64, tpu.core_type = #tpu.core_type<tc>} {
    %c0 = arith.constant 0 : index
    %c0_0 = arith.constant 0 : index
    %0 = vector.load %arg8[%c0, %c0_0] : memref<1x3xf32, #tpu.memory_space<vmem>>, vector<1x3xf32>
    %1 = arith.negf %0 : vector<1x3xf32>
    %2 = math.exp %1 : vector<1x3xf32>
    %cst = arith.constant 1.000000e+00 : f32
    %3 = vector.broadcast %cst : f32 to vector<1x3xf32>
    %4 = arith.addf %3, %2 : vector<1x3xf32>
    %5 = arith.divf %3, %4 : vector<1x3xf32>
    %c0_1 = arith.constant 0 : index
    %c0_2 = arith.constant 0 : index
    %6 = vector.load %arg0[%c0_1, %c0_2] : memref<16x32xf32, #tpu.memory_space<vmem>>, vector<16x32xf32>
    %c0_3 = arith.constant 0 : index
    %c0_4 = arith.constant 0 : index
    %7 = vector.load %arg4[%c0_3, %c0_4] : memref<32x32xf32, #tpu.memory_space<vmem>>, vector<32x32xf32>
    %cst_5 = arith.constant dense<0.000000e+00> : vector<16x32xf32>
    %8 = tpu.matmul %6, %7, %cst_5 {dimension_numbers = #tpu.dot_dimension_numbers<[1], [0], [0], [1], [0, 0, 1, 1], [], []>} : vector<16x32xf32>, vector<32x32xf32>, vector<16x32xf32> -> vector<16x32xf32>
    %c0_6 = arith.constant 0 : index
    %c0_7 = arith.constant 0 : index
    %9 = vector.load %arg5[%c0_6, %c0_7] : memref<1x32xf32, #tpu.memory_space<vmem>>, vector<1x32xf32>
    %10 = vector.broadcast %9 : vector<1x32xf32> to vector<16x32xf32>
    %11 = arith.addf %8, %10 : vector<16x32xf32>
    %c0_8 = arith.constant 0 : index
    %c0_9 = arith.constant 0 : index
    %12 = vector.load %arg1[%c0_8, %c0_9] : memref<16x16xf32, #tpu.memory_space<vmem>>, vector<16x16xf32>
    %cst_10 = arith.constant dense<0.000000e+00> : vector<16x32xf32>
    %13 = tpu.matmul %12, %11, %cst_10 {dimension_numbers = #tpu.dot_dimension_numbers<[1], [0], [0], [1], [0, 0, 1, 1], [], []>} : vector<16x16xf32>, vector<16x32xf32>, vector<16x32xf32> -> vector<16x32xf32>
    %c0_11 = arith.constant 0 : index
    %c0_12 = arith.constant 0 : index
    %14 = vector.load %arg2[%c0_11, %c0_12] : memref<16x16xf32, #tpu.memory_space<vmem>>, vector<16x16xf32>
    %cst_13 = arith.constant dense<0.000000e+00> : vector<16x32xf32>
    %15 = tpu.matmul %14, %13, %cst_13 {dimension_numbers = #tpu.dot_dimension_numbers<[1], [0], [0], [1], [0, 0, 1, 1], [], []>} : vector<16x16xf32>, vector<16x32xf32>, vector<16x32xf32> -> vector<16x32xf32>
    %cst_14 = arith.constant 0.000000e+00 : f32
    %16 = vector.broadcast %cst_14 : f32 to vector<16x32xf32>
    %17 = arith.addf %16, %11 : vector<16x32xf32>
    %18 = arith.addf %17, %13 : vector<16x32xf32>
    %19 = arith.addf %18, %15 : vector<16x32xf32>
    %c0_15 = arith.constant 0 : index
    %c0_16 = arith.constant 0 : index
    %20 = vector.load %arg9[%c0_15, %c0_16] : memref<32x32xf32, #tpu.memory_space<vmem>>, vector<32x32xf32>
    %cst_17 = arith.constant dense<0.000000e+00> : vector<16x32xf32>
    %21 = tpu.matmul %19, %20, %cst_17 {dimension_numbers = #tpu.dot_dimension_numbers<[1], [0], [0], [1], [0, 0, 1, 1], [], []>} : vector<16x32xf32>, vector<32x32xf32>, vector<16x32xf32> -> vector<16x32xf32>
    %c0_18 = arith.constant 0 : index
    %c0_19 = arith.constant 0 : index
    %22 = vector.load %arg10[%c0_18, %c0_19] : memref<1x32xf32, #tpu.memory_space<vmem>>, vector<1x32xf32>
    %23 = vector.broadcast %22 : vector<1x32xf32> to vector<16x32xf32>
    %24 = arith.addf %21, %23 : vector<16x32xf32>
    %cst_20 = arith.constant 0.000000e+00 : f32
    %25 = vector.broadcast %cst_20 : f32 to vector<16x32xf32>
    %26 = arith.maximumf %24, %25 : vector<16x32xf32>
    %27 = vector.extract_strided_slice %5 {offsets = [0, 0], sizes = [1, 1], strides = [1, 1]} : vector<1x3xf32> to vector<1x1xf32>
    %28 = vector.extract %27[0, 0] : f32 from vector<1x1xf32>
    %29 = vector.broadcast %28 : f32 to vector<16x32xf32>
    %30 = arith.mulf %29, %26 : vector<16x32xf32>
    %c0_21 = arith.constant 0 : index
    %c0_22 = arith.constant 0 : index
    %31 = vector.load %arg11[%c0_21, %c0_22] : memref<32x32xf32, #tpu.memory_space<vmem>>, vector<32x32xf32>
    %cst_23 = arith.constant dense<0.000000e+00> : vector<16x32xf32>
    %32 = tpu.matmul %30, %31, %cst_23 {dimension_numbers = #tpu.dot_dimension_numbers<[1], [0], [0], [1], [0, 0, 1, 1], [], []>} : vector<16x32xf32>, vector<32x32xf32>, vector<16x32xf32> -> vector<16x32xf32>
    %c0_24 = arith.constant 0 : index
    %c0_25 = arith.constant 0 : index
    %33 = vector.load %arg12[%c0_24, %c0_25] : memref<1x32xf32, #tpu.memory_space<vmem>>, vector<1x32xf32>
    %34 = vector.broadcast %33 : vector<1x32xf32> to vector<16x32xf32>
    %35 = arith.addf %32, %34 : vector<16x32xf32>
    %cst_26 = arith.constant 0.000000e+00 : f32
    %36 = vector.broadcast %cst_26 : f32 to vector<16x32xf32>
    %37 = arith.maximumf %35, %36 : vector<16x32xf32>
    %c0_27 = arith.constant 0 : index
    %c0_28 = arith.constant 0 : index
    %38 = vector.load %arg3[%c0_27, %c0_28] : memref<16x16xf32, #tpu.memory_space<vmem>>, vector<16x16xf32>
    %cst_29 = arith.constant dense<0.000000e+00> : vector<16x32xf32>
    %39 = tpu.matmul %38, %37, %cst_29 {dimension_numbers = #tpu.dot_dimension_numbers<[1], [0], [0], [1], [0, 0, 1, 1], [], []>} : vector<16x16xf32>, vector<16x32xf32>, vector<16x32xf32> -> vector<16x32xf32>
    %cst_30 = arith.constant 0.000000e+00 : f32
    %40 = vector.broadcast %cst_30 : f32 to vector<16x32xf32>
    %41 = arith.addf %40, %39 : vector<16x32xf32>
    %c0_31 = arith.constant 0 : index
    %c0_32 = arith.constant 0 : index
    %42 = vector.load %arg13[%c0_31, %c0_32] : memref<32x32xf32, #tpu.memory_space<vmem>>, vector<32x32xf32>
    %cst_33 = arith.constant dense<0.000000e+00> : vector<16x32xf32>
    %43 = tpu.matmul %41, %42, %cst_33 {dimension_numbers = #tpu.dot_dimension_numbers<[1], [0], [0], [1], [0, 0, 1, 1], [], []>} : vector<16x32xf32>, vector<32x32xf32>, vector<16x32xf32> -> vector<16x32xf32>
    %c0_34 = arith.constant 0 : index
    %c0_35 = arith.constant 0 : index
    %44 = vector.load %arg14[%c0_34, %c0_35] : memref<1x32xf32, #tpu.memory_space<vmem>>, vector<1x32xf32>
    %45 = vector.broadcast %44 : vector<1x32xf32> to vector<16x32xf32>
    %46 = arith.addf %43, %45 : vector<16x32xf32>
    %cst_36 = arith.constant 0.000000e+00 : f32
    %47 = vector.broadcast %cst_36 : f32 to vector<16x32xf32>
    %48 = arith.maximumf %46, %47 : vector<16x32xf32>
    %49 = vector.extract_strided_slice %5 {offsets = [0, 0], sizes = [1, 1], strides = [1, 1]} : vector<1x3xf32> to vector<1x1xf32>
    %50 = vector.extract %49[0, 0] : f32 from vector<1x1xf32>
    %51 = vector.broadcast %50 : f32 to vector<16x32xf32>
    %52 = arith.mulf %51, %26 : vector<16x32xf32>
    %53 = vector.extract_strided_slice %5 {offsets = [0, 1], sizes = [1, 1], strides = [1, 1]} : vector<1x3xf32> to vector<1x1xf32>
    %54 = vector.extract %53[0, 0] : f32 from vector<1x1xf32>
    %55 = vector.broadcast %54 : f32 to vector<16x32xf32>
    %56 = arith.mulf %55, %37 : vector<16x32xf32>
    %57 = arith.addf %52, %56 : vector<16x32xf32>
    %58 = vector.extract_strided_slice %5 {offsets = [0, 2], sizes = [1, 1], strides = [1, 1]} : vector<1x3xf32> to vector<1x1xf32>
    %59 = vector.extract %58[0, 0] : f32 from vector<1x1xf32>
    %60 = vector.broadcast %59 : f32 to vector<16x32xf32>
    %61 = arith.mulf %60, %48 : vector<16x32xf32>
    %62 = arith.addf %57, %61 : vector<16x32xf32>
    %c0_37 = arith.constant 0 : index
    %c0_38 = arith.constant 0 : index
    %63 = vector.load %arg6[%c0_37, %c0_38] : memref<32x8xf32, #tpu.memory_space<vmem>>, vector<32x8xf32>
    %cst_39 = arith.constant dense<0.000000e+00> : vector<16x8xf32>
    %64 = tpu.matmul %62, %63, %cst_39 {dimension_numbers = #tpu.dot_dimension_numbers<[1], [0], [0], [1], [0, 0, 1, 1], [], []>} : vector<16x32xf32>, vector<32x8xf32>, vector<16x8xf32> -> vector<16x8xf32>
    %c0_40 = arith.constant 0 : index
    %c0_41 = arith.constant 0 : index
    %65 = vector.load %arg7[%c0_40, %c0_41] : memref<1x8xf32, #tpu.memory_space<vmem>>, vector<1x8xf32>
    %66 = vector.broadcast %65 : vector<1x8xf32> to vector<16x8xf32>
    %67 = arith.addf %64, %66 : vector<16x8xf32>
    %cst_42 = arith.constant dense<0xFF800000> : vector<16xf32>
    %68 = vector.multi_reduction <maximumf>, %67, %cst_42 [1] : vector<16x8xf32> to vector<16xf32>
    %69 = vector.shape_cast %68 : vector<16xf32> to vector<16x1xf32>
    %70 = vector.broadcast %69 : vector<16x1xf32> to vector<16x8xf32>
    %71 = arith.subf %67, %70 : vector<16x8xf32>
    %72 = math.exp %71 : vector<16x8xf32>
    %cst_43 = arith.constant dense<0.000000e+00> : vector<16xf32>
    %73 = vector.multi_reduction <add>, %72, %cst_43 [1] : vector<16x8xf32> to vector<16xf32>
    %74 = vector.shape_cast %73 : vector<16xf32> to vector<16x1xf32>
    %75 = math.log %74 : vector<16x1xf32>
    %76 = vector.broadcast %75 : vector<16x1xf32> to vector<16x8xf32>
    %77 = arith.subf %71, %76 : vector<16x8xf32>
    %c0_44 = arith.constant 0 : index
    %c0_45 = arith.constant 0 : index
    %78 = vector.load %arg15[%c0_44, %c0_45] : memref<16x8xf32, #tpu.memory_space<vmem>>, vector<16x8xf32>
    tpu.vector_store %arg15[%c0_44, %c0_45], %77 {strides = array<i32>} : memref<16x8xf32, #tpu.memory_space<vmem>>, vector<16x8xf32>,
    return
  }
}

</mosaic_0001>

<bundles_post_ra>
// kernel: tpu_custom_call.1
= control target key start
LH: loop header
LB: loop body
LE: loop exit
PB: predicated region body
PF: predicated region fallthrough
CT: control target
= control target key end

     0   :  { %20 = vsyncpa [#allocation3], 0  ;;  %s1562_s0 = inlined_call_operand.hbm [shape: f32[16,32], index: 0, kind: input, shape index: {}]   ;;  %s1563_s1 = inlined_call_operand.hbm [shape: f32[16,16], index: 1, kind: input, shape index: {}]   ;;  %s1564_s2 = inlined_call_operand.hbm [shape: f32[16,16], index: 2, kind: input, shape index: {}]   ;;  %s1565_s3 = inlined_call_operand.hbm [shape: f32[16,16], index: 3, kind: input, shape index: {}]   ;;  %s1566_s4 = inlined_call_operand.vmem [shape: f32[32,32], index: 4, kind: input, shape index: {}]   ;;  %s1567_s5 = inlined_call_operand.vmem [shape: f32[1,32], index: 5, kind: input, shape index: {}]   ;;  %s1568_s6 = inlined_call_operand.vmem [shape: f32[32,8], index: 6, kind: input, shape index: {}]   ;;  %s1569_s7 = inlined_call_operand.vmem [shape: f32[1,8], index: 7, kind: input, shape index: {}]   ;;  %s1570_s8 = inlined_call_operand.vmem [shape: f32[1,3], index: 8, kind: input, shape index: {}]   ;;  %s1571_s9 = inlined_call_operand.vmem [shape: f32[32,32], index: 9, kind: input, shape index: {}]   ;;  %s1572_s10 = inlined_call_operand.vmem [shape: f32[1,32], index: 10, kind: input, shape index: {}]   ;;  %s1573_s11 = inlined_call_operand.hbm [shape: f32[32,32], index: 11, kind: input, shape index: {}]   ;;  %s1574_s12 = inlined_call_operand.vmem [shape: f32[1,32], index: 12, kind: input, shape index: {}]   ;;  %s1575_s13 = inlined_call_operand.hbm [shape: f32[32,32], index: 13, kind: input, shape index: {}]   ;;  %s1576_s14 = inlined_call_operand.vmem [shape: f32[1,32], index: 14, kind: input, shape index: {}]   ;;  %s1577_s15 = inlined_call_operand.vmem [shape: f32[16,8], index: 15, kind: output, shape index: {}]  }
   0x1   :  { %21 = vsyncpa [#allocation5], 0 }
   0x2   :  { %22 = vsyncpa [#allocation8], 0 }
   0x3   :  { %23 = vsyncpa [#allocation11], 0  ;;  %s1279_s18 = smov [#allocation4]   ;;  %s1280_s20 = smov [#allocation7]  }
   0x4   :  { %s41_s19 = sshll.u32 %s1279_s18, 4  ;;  %s65_s21 = sshll.u32 %s1280_s20, 4  ;;  %s42_s19 = int_to_ptr.vmem [resolvable:$true] %s41_s19  ;;  %s1369_s21 = int_to_ptr.vmem [resolvable:$true] %s65_s21 }
   0x5   :  { %s1139_s24 = scalar_lea.hbm %s1563_s1, 256 }
   0x6   :  { %p1140_p0 = scmp.ne.s32.totalorder %s1563_s1, %s1139_s24  ;;  %p1143_p1 = scmp.lt.u32.totalorder %s1139_s24, %s1563_s1 }
   0x8   :  { %p1145_p2 = pnand %p1143_p1, %p1140_p0 }
   0xa   :  { %1148 = shalt.err (!%p1145_p2)
}
   0xb   :  { %s1149_s29 = scalar_lea.vmem %s42_s19, 256  ;;  %p1154_p4 = scmp.lt.s32.totalorder %s42_s19, %s42_s19 }
   0xc   :  { %p1150_p3 = scmp.ne.s32.totalorder %s42_s19, %s1149_s29  ;;  %p1155_p5 = scmp.lt.s32.totalorder %s1149_s29, %s1149_s29 }
   0xe   :  { %p1156_p6 = por %p1155_p5, %p1154_p4 }
  0x10   :  { %p1157_p7 = pnand %p1156_p6, %p1150_p3 }
  0x12   :  { %1160 = shalt.err (!%p1157_p7)
}
  0x13   :  { %s1281_s30 = smov 128   ;;  %s1282_s16 = smov 8  }
  0x14   :  { %47 = dma.hbm_to_vmem [thread:$0]  %s1563_s1, 256, %s42_s19, [#allocation5], %s1281_s30, %s1281_s30, %s1282_s16  }
  0x15   :  { %s1161_s23 = scalar_lea.hbm %s1565_s3, 256 }
  0x16   :  { %p1162_p8 = scmp.ne.s32.totalorder %s1565_s3, %s1161_s23  ;;  %p1165_p9 = scmp.lt.u32.totalorder %s1161_s23, %s1565_s3 }
  0x18   :  { %p1167_p10 = pnand %p1165_p9, %p1162_p8 }
  0x1a   :  { %1170 = shalt.err (!%p1167_p10)
}
  0x1b   :  { %s1171_s28 = scalar_lea.vmem %s1369_s21, 256  ;;  %p1176_p12 = scmp.lt.s32.totalorder %s1369_s21, %s1369_s21 }
  0x1c   :  { %p1172_p11 = scmp.ne.s32.totalorder %s1369_s21, %s1171_s28  ;;  %p1177_p13 = scmp.lt.s32.totalorder %s1171_s28, %s1171_s28 }
  0x1e   :  { %p1178_p0 = por %p1177_p13, %p1176_p12 }
  0x20   :  { %p1179_p1 = pnand %p1178_p0, %p1172_p11 }
  0x22   :  { %1182 = shalt.err (!%p1179_p1)
}
  0x23   :  { %71 = dma.hbm_to_vmem [thread:$0]  %s1565_s3, 256, %s1369_s21, [#allocation8], %s1281_s30, %s1281_s30, %s1282_s16  }
  0x24   :  { %s1283_s29 = smov [#allocation2]   ;;  %s1284_s18 = smov [#allocation6]  }
  0x25   :  { %s29_s17 = sshll.u32 %s1283_s29, 4  ;;  %s53_s20 = sshll.u32 %s1284_s18, 4  ;;  %s30_s17 = int_to_ptr.vmem [resolvable:$true] %s29_s17  ;;  %s1406_s20 = int_to_ptr.vmem [resolvable:$true] %s53_s20 }
  0x26   :  { %s1183_s24 = scalar_lea.hbm %s1562_s0, 256 }
  0x27   :  { %p1184_p2 = scmp.ne.s32.totalorder %s1562_s0, %s1183_s24  ;;  %p1187_p3 = scmp.lt.u32.totalorder %s1183_s24, %s1562_s0 }
  0x29   :  { %p1189_p4 = pnand %p1187_p3, %p1184_p2 }
  0x2b   :  { %1192 = shalt.err (!%p1189_p4)
}
  0x2c   :  { %s1193_s3 = scalar_lea.vmem %s30_s17, 256  ;;  %p1198_p6 = scmp.lt.s32.totalorder %s30_s17, %s30_s17 }
  0x2d   :  { %p1194_p5 = scmp.ne.s32.totalorder %s30_s17, %s1193_s3  ;;  %p1199_p7 = scmp.lt.s32.totalorder %s1193_s3, %s1193_s3 }
  0x2f   :  { %p1200_p8 = por %p1199_p7, %p1198_p6 }
  0x31   :  { %p1201_p9 = pnand %p1200_p8, %p1194_p5 }
  0x33   :  { %1204 = shalt.err (!%p1201_p9)
}
  0x34   :  { %35 = dma.hbm_to_vmem [thread:$0]  %s1562_s0, 256, %s30_s17, [#allocation3], %s1281_s30, %s1281_s30, %s1282_s16  }
  0x35   :  { %s1205_s18 = scalar_lea.hbm %s1564_s2, 256 }
  0x36   :  { %p1206_p10 = scmp.ne.s32.totalorder %s1564_s2, %s1205_s18  ;;  %p1209_p11 = scmp.lt.u32.totalorder %s1205_s18, %s1564_s2 }
  0x38   :  { %p1211_p12 = pnand %p1209_p11, %p1206_p10 }
  0x3a   :  { %1214 = shalt.err (!%p1211_p12)
}
  0x3b   :  { %s1215_s26 = scalar_lea.vmem %s1406_s20, 256  ;;  %p1220_p0 = scmp.lt.s32.totalorder %s1406_s20, %s1406_s20 }
  0x3c   :  { %p1216_p13 = scmp.ne.s32.totalorder %s1406_s20, %s1215_s26  ;;  %p1221_p1 = scmp.lt.s32.totalorder %s1215_s26, %s1215_s26 }
  0x3e   :  { %p1222_p2 = por %p1221_p1, %p1220_p0 }
  0x40   :  { %p1223_p3 = pnand %p1222_p2, %p1216_p13 }
  0x42   :  { %1226 = shalt.err (!%p1223_p3)
}
  0x43   :  { %59 = dma.hbm_to_vmem [thread:$0]  %s1564_s2, 256, %s1406_s20, [#allocation5], %s1281_s30, %s1281_s30, %s1282_s16  }
  0x44   :  { %s1285_s27 = smov [#allocation9]   ;;  %s1286_s3 = smov [#allocation10]  }
  0x45   :  { %s91_s28 = sshll.u32 %s1285_s27, 4  ;;  %s105_s21 = sshll.u32 %s1286_s3, 4  ;;  %s92_s28 = int_to_ptr.vmem [resolvable:$true] %s91_s28  ;;  %s1443_s21 = int_to_ptr.vmem [resolvable:$true] %s105_s21 }
  0x46   :  { %s1227_s29 = scalar_lea.hbm %s1573_s11, 512 }
  0x47   :  { %p1228_p4 = scmp.ne.s32.totalorder %s1573_s11, %s1227_s29  ;;  %p1231_p5 = scmp.lt.u32.totalorder %s1227_s29, %s1573_s11 }
  0x49   :  { %p1233_p6 = pnand %p1231_p5, %p1228_p4 }
  0x4b   :  { %1236 = shalt.err (!%p1233_p6)
}
  0x4c   :  { %s1237_s2 = scalar_lea.vmem %s92_s28, 512  ;;  %p1242_p8 = scmp.lt.s32.totalorder %s92_s28, %s92_s28 }
  0x4d   :  { %p1238_p7 = scmp.ne.s32.totalorder %s92_s28, %s1237_s2  ;;  %p1243_p9 = scmp.lt.s32.totalorder %s1237_s2, %s1237_s2 }
  0x4f   :  { %p1244_p10 = por %p1243_p9, %p1242_p8 }
  0x51   :  { %p1245_p11 = pnand %p1244_p10, %p1238_p7 }
  0x53   :  { %1248 = shalt.err (!%p1245_p11)
}
  0x54   :  { %97 = dma.hbm_to_vmem [thread:$0]  %s1573_s11, 512, %s92_s28, [#allocation8], %s1281_s30, %s1281_s30, %s1282_s16  }
  0x55   :  { %s1249_s17 = scalar_lea.hbm %s1575_s13, 512 }
  0x56   :  { %p1250_p12 = scmp.ne.s32.totalorder %s1575_s13, %s1249_s17  ;;  %p1253_p13 = scmp.lt.u32.totalorder %s1249_s17, %s1575_s13 }
  0x58   :  { %p1255_p0 = pnand %p1253_p13, %p1250_p12 }
  0x5a   :  { %1258 = shalt.err (!%p1255_p0)
}
  0x5b   :  { %s1259_s29 = scalar_lea.vmem %s1443_s21, 512  ;;  %p1264_p2 = scmp.lt.s32.totalorder %s1443_s21, %s1443_s21 }
  0x5c   :  { %p1260_p1 = scmp.ne.s32.totalorder %s1443_s21, %s1259_s29  ;;  %p1265_p3 = scmp.lt.s32.totalorder %s1259_s29, %s1259_s29 }
  0x5e   :  { %p1266_p4 = por %p1265_p3, %p1264_p2 }
  0x60   :  { %p1267_p5 = pnand %p1266_p4, %p1260_p1 }
  0x62   :  { %1270 = shalt.err (!%p1267_p5)
}
  0x63   :  { %111 = dma.hbm_to_vmem [thread:$0]  %s1575_s13, 512, %s1443_s21, [#allocation11], %s1281_s30, %s1281_s30, %s1282_s16  }
  0x64   :  { %1271 = dma.done.wait [#allocation3], 256  }
  0x65   :  { %1272 = vsyncadd [#allocation3], 4294967040 }
  0x66   :  { %1273 = dma.done.wait [#allocation5], 512  }
  0x67   :  { %1274 = vsyncadd [#allocation5], 4294966784 }
  0x68   :  { %1275 = dma.done.wait [#allocation8], 768  }
  0x69   :  { %1276 = vsyncadd [#allocation8], 4294966528 }
  0x6a   :  { %1277 = dma.done.wait [#allocation11], 512  }
  0x6b   :  { %1278 = vsyncadd [#allocation11], 4294966784  ;;  %vm152_vm0 = vcmask 261120   ;;  %v141_v0 = vld [vmem:[%s1566_s4] sm:$0xff]  ;;  %v142_v1 = vld [vmem:[%s1566_s4 + $0x8] sm:$0xff]  ;;  %vm236_vm1 = vcmask 130048  }
  0x6c   :  { %v143_v2 = vld [vmem:[%s1566_s4 + $0x10] sm:$0xff]  ;;  %v1059_v3 = vpack.c.bf16 %v142_v1, %v141_v0  ;;  %v144_v4 = vld [vmem:[%s1566_s4 + $0x18] sm:$0xff]  ;;  %v139_v5 = vld [vmem:[#allocation2] sm:$0xff]  ;;  %s1288_s18 = smov 126   ;;  %vm884_vm2 = vcmask 64512  }
  0x6d   :  { %v1063_v6 = vpack.c.bf16 %v144_v4, %v143_v2  ;;  %991 = vmatprep.mubr.msk.f32.mxu0 %vm152_vm0, %v139_v5  ;;  %v140_v7 = vld [vmem:[#allocation2 + $0x8] sm:$0xff]  ;;  %v234_v8 = vld [vmem:[#allocation4] sm:$0xff]  ;;  %v920_v9 = vld [vmem:[%s1567_s5] ss:$0 sm:$0xff] }
  0x6e   :  { %1060 = vmatprep.subr.bf16.mxu0 %v1059_v3  ;;  %998 = vmatprep.mubr.msk.f32.mxu1 %vm236_vm1, %v234_v8  ;;  %v235_v15 = vld [vmem:[#allocation4 + $0x8] sm:$0xff]  ;;  %v318_v16 = vld [vmem:[#allocation6] sm:$0xff]  ;;  %v408_v18 = vld [vmem:[%s1571_s9 + $0x8] sm:$0xff] }
  0x6f   :  { %1062 = vmatpush3.bf16.msra.mxu0 %v1059_v3  ;;  %v407_v17 = vld [vmem:[%s1571_s9] sm:$0xff]  ;;  %v319_v23 = vld [vmem:[#allocation6 + $0x8] sm:$0xff]  ;;  %v409_v24 = vld [vmem:[%s1571_s9 + $0x10] sm:$0xff] }
  0x70   :  { %1064 = vmatprep.subr.bf16.mxu0 %v1063_v6  ;;  %v1075_v19 = vpack.c.bf16 %v408_v18, %v407_v17  ;;  %v410_v25 = vld [vmem:[%s1571_s9 + $0x18] sm:$0xff]  ;;  %v132_v27 = vld [vmem:[%s1570_s8] sm:$0x1]  ;;  %v506_v39 = vld [vmem:[#allocation9 + $0x8] sm:$0xff]  ;;  %s1287_s8 = smov 127  }
  0x71   :  { %v1079_v26 = vpack.c.bf16 %v410_v25, %v409_v24  ;;  %v919_v28 = vmul.f32 -1.442695, %v132_v27  ;;  %v505_v38 = vld [vmem:[#allocation9] sm:$0xff]  ;;  %v507_v41 = vld [vmem:[#allocation9 + $0x10] sm:$0xff]  ;;  %v508_v42 = vld [vmem:[#allocation9 + $0x18] sm:$0xff] }
  0x72   :  { %v1083_v40 = vpack.c.bf16 %v506_v39, %v505_v38  ;;  %v1087_v43 = vpack.c.bf16 %v508_v42, %v507_v41  ;;  %v927_v45 = vld [vmem:[%s1572_s10] ss:$0 sm:$0xff]  ;;  %v599_v55 = vld [vmem:[#allocation7] sm:$0xff]  ;;  %v683_v57 = vld [vmem:[#allocation10 + $0x8] sm:$0xff] }
  0x73   :  { %1066 = vmatpush3.bf16.msra.mxu0 %v1063_v6  ;;  %1127 = vpow2.f32 %v919_v28  ;;  %v682_v56 = vld [vmem:[#allocation10] sm:$0xff]  ;;  %v684_v58 = vld [vmem:[#allocation10 + $0x10] sm:$0xff]  ;;  %v685_v60 = vld [vmem:[#allocation10 + $0x18] sm:$0xff] }
  0x74   :  { %1076 = vmatprep.subr.bf16.mxu0 %v1075_v19  ;;  %v1095_v59 = vpack.c.bf16 %v683_v57, %v682_v56  ;;  %v1099_v61 = vpack.c.bf16 %v685_v60, %v684_v58  ;;  %v930_v62 = vld [vmem:[%s1574_s12] ss:$0 sm:$0xff]  ;;  %v600_v6 = vld [vmem:[#allocation7 + $0x8] sm:$0xff] }
  0x75   :  { %v935_v17 = vld [vmem:[%s1576_s14] ss:$0 sm:$0xff] }
  0x76   :  { %992 = vmatmul.mubr.msk.f32.vlgmr.msra.gmra.mrb[0].mxu0 %vm152_vm0, %v140_v7 }
  0x77   :  { %1078 = vmatpush3.bf16.msra.mxu0 %v1075_v19 }
  0x78   :  { %1080 = vmatprep.subr.bf16.mxu0 %v1079_v26 }
  0x7b   :  { %1082 = vmatpush3.bf16.msra.mxu0 %v1079_v26 }
  0x7d   :  { %v1128_v29 = vpop.eup %1127 }
  0x7e   :  { %v136_v30 = vadd.f32 1.0, %v1128_v29 }
  0x80   :  { %1129 = vrcp.f32 %v136_v30 }
  0x8a   :  { %v1130_v31 = vpop.eup %1129 }
  0x8b   :  { %1111 = vpush %v1130_v31  ;;  %776 = vrot.lane.b32.xlu0 %v1130_v31, %s1287_s8 }
  0x8f   :  { %784 = vrot.lane.b32.xlu0 %v1130_v31, %s1288_s18 }
  0xbc   :  { %s1112_s11 = spop %1111 }
  0xbd   :  { %v502_v51 = vstv %s1112_s11 }
  0xfd   :  { %v777_v44 = vpop.permute.xlu0 %776 }
  0xfe   :  { %1113 = vpush %v777_v44 }
 0x101   :  { %v785_v7 = vpop.permute.xlu0 %784 }
 0x102   :  { %1115 = vpush %v785_v7 }
 0x12f   :  { %s1114_s16 = spop %1113 }
 0x133   :  { %s1116_s25 = spop %1115 }
 0x134   :  { %v787_v24 = vstv %s1116_s25 }
 0x149   :  { %v993_v10 = vpop.f32.mrb[0].mxu0 }
 0x14a   :  { %v231_v11 = vadd.f32 %v993_v10, %v920_v9  ;;  %v225_v12 = vpop.f32.mrb[1].mxu0  ;;  %v792_v10 = vld [vmem:[%s1568_s6] sm:$0xff] }
 0x14b   :  { %v226_v13 = vadd.f32 %v920_v9, %v225_v12 }
 0x14d   :  { %v1067_v14 = vpack.c.bf16 %v231_v11, %v226_v13 }
 0x14f   :  { %1068 = vmatprep.subr.bf16.mxu1 %v1067_v14 }
 0x150   :  { %1070 = vmatpush3.bf16.msra.mxu1 %v1067_v14  ;;  %v795_v14 = vld [vmem:[%s1568_s6 + $0x18] sm:$0xff] }
 0x153   :  { %999 = vmatmul.mubr.msk.f32.vlgmr.msra.gmra.mrb[0].mxu1 %vm236_vm1, %v235_v15 }
 0x154   :  { %1005 = vmatprep.mubr.msk.f32.mxu1 %vm236_vm1, %v318_v16  ;;  %v779_v16 = vstv %s1114_s16 }
 0x226   :  { %v1000_v20 = vpop.f32.mrb[0].mxu1 }
 0x227   :  { %v309_v21 = vpop.f32.mrb[1].mxu1  ;;  %v404_v32 = vadd.f32 %v1000_v20, %v231_v11  ;;  %v793_v11 = vld [vmem:[%s1568_s6 + $0x8] sm:$0xff] }
 0x228   :  { %v1071_v22 = vpack.c.bf16 %v1000_v20, %v309_v21  ;;  %v403_v33 = vadd.f32 %v309_v21, %v226_v13  ;;  %v1103_v12 = vpack.c.bf16 %v793_v11, %v792_v10  ;;  %v794_v13 = vld [vmem:[%s1568_s6 + $0x10] sm:$0xff] }
 0x229   :  { %v1107_v15 = vpack.c.bf16 %v795_v14, %v794_v13 }
 0x22a   :  { %1072 = vmatprep.subr.bf16.mxu1 %v1071_v22 }
 0x22b   :  { %1074 = vmatpush3.bf16.msra.mxu1 %v1071_v22 }
 0x22c   :  { %1084 = vmatprep.subr.bf16.mxu1 %v1083_v40 }
 0x22e   :  { %1006 = vmatmul.mubr.msk.f32.vlgmr.msra.gmra.mrb[2].mxu1 %vm236_vm1, %v319_v23 }
 0x22f   :  { %1086 = vmatpush3.bf16.msra.mxu1 %v1083_v40 }
 0x230   :  { %1088 = vmatprep.subr.bf16.mxu1 %v1087_v43 }
 0x233   :  { %1090 = vmatpush3.bf16.msra.mxu1 %v1087_v43 }
 0x234   :  { %1096 = vmatprep.subr.bf16.mxu1 %v1095_v59 }
 0x301   :  { %v1007_v34 = vpop.f32.mrb[2].mxu1 }
 0x302   :  { %v406_v35 = vadd.f32 %v1007_v34, %v404_v32  ;;  %v392_v36 = vpop.f32.mrb[3].mxu1 }
 0x303   :  { %v405_v37 = vadd.f32 %v403_v33, %v392_v36  ;;  %v938_v33 = vld [vmem:[%s1569_s7] ss:$0 sm:$0xff] }
 0x305   :  { %1016 = vmatprep.mubr.msk.f32.mxu0 %vm152_vm0, %v405_v37 }
 0x306   :  { %1017 = vmatmul.mubr.msk.f32.vlgmr.msra.gmra.mrb[2].mxu0 %vm152_vm0, %v406_v35 }
 0x307   :  { %1034 = vmatprep.mubr.msk.f32.mxu0 %vm236_vm1, %v599_v55 }
 0x3d9   :  { %v1018_v46 = vpop.f32.mrb[2].mxu0 }
 0x3da   :  { %v496_v47 = vadd.f32 %v1018_v46, %v927_v45  ;;  %v490_v48 = vpop.f32.mrb[3].mxu0 }
 0x3db   :  { %v491_v49 = vadd.f32 %v927_v45, %v490_v48 }
 0x3dc   :  { %v500_v50 = vmax.f32 %v496_v47, 0.0 }
 0x3dd   :  { %v499_v52 = vmax.f32 %v491_v49, 0.0 }
 0x3de   :  { %v504_v54 = vmul.f32 %v502_v51, %v500_v50 }
 0x3df   :  { %v503_v53 = vmul.f32 %v502_v51, %v499_v52 }
 0x3e1   :  { %1027 = vmatprep.mubr.msk.f32.mxu1 %vm152_vm0, %v503_v53 }
 0x3e2   :  { %1028 = vmatmul.mubr.msk.f32.vlgmr.msra.gmra.mrb[4].mxu1 %vm152_vm0, %v504_v54 }
 0x3e3   :  { %1098 = vmatpush3.bf16.msra.mxu1 %v1095_v59 }
 0x3e4   :  { %1100 = vmatprep.subr.bf16.mxu1 %v1099_v61 }
 0x3e7   :  { %1102 = vmatpush3.bf16.msra.mxu1 %v1099_v61 }
 0x4b5   :  { %v1029_v63 = vpop.f32.mrb[4].mxu1 }
 0x4b6   :  { %v594_v0 = vadd.f32 %v1029_v63, %v930_v62  ;;  %v588_v1 = vpop.f32.mrb[5].mxu1 }
 0x4b7   :  { %v589_v2 = vadd.f32 %v930_v62, %v588_v1 }
 0x4b8   :  { %v598_v3 = vmax.f32 %v594_v0, 0.0 }
 0x4b9   :  { %v597_v4 = vmax.f32 %v589_v2, 0.0 }
 0x4ba   :  { %v781_v19 = vmul.f32 %v779_v16, %v598_v3 }
 0x4bb   :  { %v1091_v5 = vpack.c.bf16 %v598_v3, %v597_v4  ;;  %v780_v22 = vmul.f32 %v779_v16, %v597_v4 }
 0x4bc   :  { %v783_v27 = vadd.f32 %v781_v19, %v504_v54 }
 0x4bd   :  { %1092 = vmatprep.subr.bf16.mxu0 %v1091_v5  ;;  %v782_v29 = vadd.f32 %v780_v22, %v503_v53 }
 0x4be   :  { %1094 = vmatpush3.bf16.msra.mxu0 %v1091_v5 }
 0x4bf   :  { %1104 = vmatprep.subr.bf16.mxu0 %v1103_v12 }
 0x4c1   :  { %1035 = vmatmul.mubr.msk.f32.vlgmr.msra.gmra.mrb[4].mxu0 %vm236_vm1, %v600_v6 }
 0x4c2   :  { %1106 = vmatpush3.bf16.msra.mxu0 %v1103_v12 }
 0x4c3   :  { %1108 = vmatprep.subr.bf16.mxu0 %v1107_v15 }
 0x4c6   :  { %1110 = vmatpush3.bf16.msra.mxu0 %v1107_v15 }
 0x594   :  { %v1036_v8 = vpop.f32.mrb[4].mxu0 }
 0x595   :  { %v673_v9 = vpop.f32.mrb[5].mxu0 }
 0x596   :  { %1045 = vmatprep.mubr.msk.f32.mxu1 %vm152_vm0, %v673_v9 }
 0x597   :  { %1046 = vmatmul.mubr.msk.f32.vlgmr.msra.gmra.mrb[6].mxu1 %vm152_vm0, %v1036_v8 }
 0x66a   :  { %v1047_v18 = vpop.f32.mrb[6].mxu1 }
 0x66b   :  { %v771_v20 = vadd.f32 %v1047_v18, %v935_v17  ;;  %v765_v21 = vpop.f32.mrb[7].mxu1 }
 0x66c   :  { %v766_v23 = vadd.f32 %v935_v17, %v765_v21 }
 0x66d   :  { %v775_v25 = vmax.f32 %v771_v20, 0.0 }
 0x66e   :  { %v774_v26 = vmax.f32 %v766_v23, 0.0 }
 0x66f   :  { %v789_v28 = vmul.f32 %v787_v24, %v775_v25 }
 0x670   :  { %v788_v30 = vmul.f32 %v787_v24, %v774_v26 }
 0x671   :  { %v791_v31 = vadd.f32 %v789_v28, %v783_v27 }
 0x672   :  { %v790_v32 = vadd.f32 %v788_v30, %v782_v29 }
 0x674   :  { %1056 = vmatprep.mubr.msk.f32.mxu0 %vm152_vm0, %v790_v32 }
 0x675   :  { %1057 = vmatmul.mubr.msk.f32.vlgmr.msra.gmra.mrb[6].mxu0 %vm152_vm0, %v791_v31 }
 0x748   :  { %v1058_v34 = vpop.f32.mrb[6].mxu0 }
 0x749   :  { %v875_v35 = vpop.f32.mrb[7].mxu0  ;;  %v881_v37 = vadd.f32 %v1058_v34, %v938_v33 }
 0x74a   :  { %v876_v36 = vadd.f32 %v938_v33, %v875_v35 }
 0x74b   :  { %v888_v39 = vsel %vm884_vm2, %v881_v37, -inf }
 0x74c   :  { %v885_v38 = vsel %vm884_vm2, %v876_v36, -inf }
 0x74d   :  { %886 = vmax.xlane.f32.xlu1 %v885_v38 }
 0x751   :  { %889 = vmax.xlane.f32.xlu1 %v888_v39 }
 0x7da   :  { %v887_v40 = vpop.xlane.xlu1 %886 }
 0x7db   :  { %v891_v41 = vsub.f32 %v876_v36, %v887_v40 }
 0x7dd   :  { %v893_v42 = vmul.f32 1.442695, %v891_v41 }
 0x7de   :  { %v890_v43 = vpop.xlane.xlu1 %889 }
 0x7df   :  { %1131 = vpow2.f32 %v893_v42  ;;  %v892_v44 = vsub.f32 %v881_v37, %v890_v43 }
 0x7e1   :  { %v895_v45 = vmul.f32 1.442695, %v892_v44 }
 0x7e3   :  { %1133 = vpow2.f32 %v895_v45 }
 0x7e9   :  { %v1132_v46 = vpop.eup %1131 }
 0x7ea   :  { %v897_v47 = vsel %vm884_vm2, %v1132_v46, 0.0 }
 0x7eb   :  { %898 = vadd.xlane.f32.xlu0 %v897_v47 }
 0x7ed   :  { %v1134_v48 = vpop.eup %1133 }
 0x7ee   :  { %v900_v49 = vsel %vm884_vm2, %v1134_v48, 0.0 }
 0x7ef   :  { %901 = vadd.xlane.f32.xlu1 %v900_v49 }
 0x878   :  { %v899_v50 = vpop.xlane.xlu0 %898 }
 0x879   :  { %1135 = vlog2.f32 %v899_v50 }
 0x87c   :  { %v902_v51 = vpop.xlane.xlu1 %901 }
 0x87d   :  { %1137 = vlog2.f32 %v902_v51 }
 0x883   :  { %v1136_v52 = vpop.eup %1135 }
 0x884   :  { %v904_v53 = vmul.f32 0.6931472, %v1136_v52 }
 0x886   :  { %v907_v54 = vsub.f32 %v891_v41, %v904_v53 }
 0x887   :  { %v1138_v55 = vpop.eup %1137 }
 0x888   :  { %909 = vst.msk [vmem:[%s1577_s15] sm:$0xff] %vm884_vm2, %v907_v54  ;;  %v906_v56 = vmul.f32 0.6931472, %v1138_v55 }
 0x88a   :  { %v908_v57 = vsub.f32 %v892_v44, %v906_v56 }
 0x88c   :  { %910 = vst.msk [vmem:[%s1577_s15 + $0x8] sm:$0xff] %vm884_vm2, %v908_v57 }
 0x88d   :  { %915 = vsyncpa [#allocation3], 1 }
 0x88e   :  { %916 = vsyncpa [#allocation5], 1 }
 0x88f   :  { %917 = vsyncpa [#allocation8], 1 }
 0x890   :  { %918 = vsyncpa [#allocation11], 1 }

</bundles_post_ra>
